<compile_context>
chip_gen: v7x
topology: tpu7x:2x2x1
jax: 0.10.0
libtpu: 0.0.40
codegen_flags: <defaults>
</compile_context>

<pallas_src>
import functools

import jax
import jax.numpy as jnp
from jax import lax
from jax.experimental import pallas as pl
from jax.experimental.pallas import tpu as pltpu

_LANES = 128
_SUBLANES = 8
_ROW_ALIGN = _SUBLANES * _LANES          # 1024 elements -> slab row count is a multiple of 8
_CHUNK_ROWS = 256                        # per-chunk accumulate bounds vreg live ranges
_STREAM_BUDGET_BYTES = 16 * 1024 * 1024  # cap for double-buffered input streams
_VMEM_LIMIT_BYTES = 32 * 1024 * 1024     # bump v5e's 16 MiB scoped default; == default on v6e/v7x


def _tensorcores_per_chip():
    """Best-effort TensorCores-per-chip (2 only on v7x-class parts)."""
    try:
        kind = jax.devices()[0].device_kind.lower()
    except Exception:  # pragma: no cover - defensive
        return 1
    return 2 if ("v7" in kind or "7x" in kind) else 1


def _make_ds_bce_kernel(num_levels, tile_rows, chunk_rows, total_rows,
                        tiles_per_core, needs_mask, first_masked_tile,
                        binary_target):
    n_chunks = tile_rows // chunk_rows
    sub = chunk_rows // _SUBLANES

    def elem_loss(p, t, one_minus_t):
        if binary_target:
            # Exact for 0/1 targets; one EUP log per element instead of two.
            p_sel = jnp.where(t > 0.5, p, 1.0 - p)
            return -jnp.maximum(jnp.log(p_sel), -100.0)
        # PyTorch's binary_cross_entropy clamps log outputs at -100.  The clamp
        # must stay BEFORE the multiply: 0 * -inf would be NaN.
        log_p = jnp.maximum(jnp.log(p), -100.0)
        log_1mp = jnp.maximum(jnp.log(1.0 - p), -100.0)
        return -(t * log_p + one_minus_t * log_1mp)

    def kernel(*refs):
        t_ref = refs[0]
        p_refs = refs[1:1 + num_levels]
        out_ref = refs[1 + num_levels]
        acc_ref = refs[2 + num_levels]

        c = pl.program_id(0)
        i = pl.program_id(1)

        @pl.when(i == 0)
        def _():
            acc_ref[...] = jnp.zeros_like(acc_ref)

        def accumulate(masked):
            if masked:
                tile_base = (c * tiles_per_core + i) * tile_rows
            # Static Python chunk loop == fully unrolled inner loop with STATIC
            # (aligned) slice offsets; the per-chunk `+=` into acc_ref keeps at
            # most one chunk of f32 intermediates live, bounding vreg pressure,
            # and (1 - t) is recomputed per chunk rather than hoisted tile-wide.
            for ci in range(n_chunks):
                r0 = ci * chunk_rows
                t = t_ref[r0:r0 + chunk_rows, :].astype(jnp.float32)
                one_minus_t = None if binary_target else 1.0 - t
                if masked:
                    rows = (tile_base + r0
                            + lax.broadcasted_iota(jnp.int32, (chunk_rows, _LANES), 0))
                    valid = rows < total_rows
                for l in range(num_levels):
                    p = p_refs[l][r0:r0 + chunk_rows, :].astype(jnp.float32)
                    loss = elem_loss(p, t, one_minus_t)
                    if masked:
                        loss = jnp.where(valid, loss, 0.0)
                    # (chunk_rows,128) -> (8,128): layout-preserving reshape +
                    # vreg adds only (VALU); no cross-lane reduce in hot loop.
                    acc_ref[l] += jnp.sum(loss.reshape(sub, _SUBLANES, _LANES), axis=0)

        if needs_mask:
            is_masked_step = (c * tiles_per_core + i) >= first_masked_tile

            @pl.when(jnp.logical_not(is_masked_step))
            def _():
                accumulate(masked=False)

            @pl.when(is_masked_step)
            def _():
                accumulate(masked=True)
        else:
            accumulate(masked=False)

        @pl.when(i == pl.num_programs(1) - 1)
        def _():
            out_ref[...] = acc_ref[...].reshape(out_ref.shape)

    return kernel


def _ds_bce_level_sums(target_2d, pred_2ds, *, tile_rows, binary_target):
    """Per-level sums of elementwise BCE over (M, 128) native-dtype slabs."""
    M = target_2d.shape[0]
    L = len(pred_2ds)

    # Tile sizing: biggest row tile whose (L+1) double-buffered input streams
    # fit in the streaming budget (native dtypes -> bf16/uint8 inputs simply
    # stream proportionally more rows per step).
    stream_bytes_per_row = 2 * _LANES * (
        target_2d.dtype.itemsize + sum(p.dtype.itemsize for p in pred_2ds))
    budget_rows = max(_SUBLANES,
                      (_STREAM_BUDGET_BYTES // stream_bytes_per_row)
                      // _SUBLANES * _SUBLANES)
    tile_rows = max(_SUBLANES, (tile_rows // _SUBLANES) * _SUBLANES)
    tile_rows = min(M, tile_rows, budget_rows)
    if tile_rows >= _CHUNK_ROWS:
        tile_rows = (tile_rows // _CHUNK_ROWS) * _CHUNK_ROWS
        chunk_rows = _CHUNK_ROWS
    else:
        chunk_rows = tile_rows

    total_tiles = pl.cdiv(M, tile_rows)
    num_cores = _tensorcores_per_chip()
    if total_tiles < num_cores:
        num_cores = 1
    tiles_per_core = pl.cdiv(total_tiles, num_cores)

    needs_clamp = num_cores * tiles_per_core > total_tiles   # uneven core split
    partial_last = total_tiles * tile_rows != M              # ragged last tile
    needs_mask = needs_clamp or partial_last
    first_masked_tile = total_tiles - 1 if partial_last else total_tiles
    last_tile = total_tiles - 1

    if needs_clamp:
        # Overflow steps re-read the last valid block; the in-kernel row mask
        # zeroes their contribution.
        def in_index_map(c, i):
            return (jnp.minimum(c * tiles_per_core + i, last_tile), 0)
    else:
        def in_index_map(c, i):
            return (c * tiles_per_core + i, 0)

    in_spec = pl.BlockSpec((tile_rows, _LANES), in_index_map)
    kernel = _make_ds_bce_kernel(
        num_levels=L, tile_rows=tile_rows, chunk_rows=chunk_rows, total_rows=M,
        tiles_per_core=tiles_per_core, needs_mask=needs_mask,
        first_masked_tile=first_masked_tile, binary_target=binary_target)

    if num_cores > 1:
        # Only CORE_PARALLEL actually shards grid axes across v7x's 2 TCs.
        dims = (getattr(pltpu, "CORE_PARALLEL", "parallel"),
                getattr(pltpu, "ARBITRARY", "arbitrary"))
    else:
        dims = ("arbitrary", "arbitrary")

    out = pl.pallas_call(
        kernel,
        out_shape=jax.ShapeDtypeStruct((num_cores, L, _SUBLANES, _LANES), jnp.float32),
        grid_spec=pltpu.PrefetchScalarGridSpec(
            num_scalar_prefetch=0,
            grid=(num_cores, tiles_per_core),
            in_specs=[in_spec] * (L + 1),
            out_specs=pl.BlockSpec((1, L, _SUBLANES, _LANES),
                                   lambda c, i: (c, 0, 0, 0)),
            scratch_shapes=[pltpu.VMEM((L, _SUBLANES, _LANES), jnp.float32)],
        ),
        compiler_params=pltpu.CompilerParams(
            dimension_semantics=dims,
            vmem_limit_bytes=_VMEM_LIMIT_BYTES),
    )(target_2d, *pred_2ds)

    return jnp.sum(out, axis=(0, 2, 3))   # (L,) per-level BCE sums


def _flatten_to_lanes(x):
    """Lane-dense (M, 128) slab in the array's NATIVE dtype (no upcast copy).

    The reshape of a contiguous array is a free bitcast (under jit); only when
    numel is not a multiple of 1024 is a small neutral pad appended
    (p = 1, t = 1 -> exactly zero BCE contribution thanks to the -100 clamp).
    """
    flat = x.reshape(-1)
    rem = flat.shape[0] % _ROW_ALIGN
    if rem:
        flat = jnp.pad(flat, (0, _ROW_ALIGN - rem), constant_values=1)
    return flat.reshape(-1, _LANES)


def ds_bce_loss(pred_dict, target, aux_weight=0.4, reduction="mean", *,
                tile_rows=2048, binary_target=False):
    """JAX/Pallas equivalent of DSBCELoss.forward.

    binary_target=True enables a single-log formulation that is exact for 0/1
    masks and halves EUP (transcendental) work (matters most on v7x).
    NOTE: like the PyTorch reference, `reduction` is only validated — each
    level always uses F.binary_cross_entropy's default 'mean'.
    """
    assert isinstance(pred_dict, dict)
    assert "level_0" in pred_dict
    if reduction not in ("none", "mean", "sum"):
        raise ValueError(f"Unsupported reduction mode: {reduction}. "
                         f"Supported ones are: ['none', 'mean', 'sum']")
    keys = list(pred_dict.keys())
    for k in keys:
        if pred_dict[k].shape != target.shape:
            raise ValueError(f"pred[{k!r}] shape {pred_dict[k].shape} does not "
                             f"match target shape {target.shape}")

    numel = target.size
    # Native-dtype streaming: no .astype(f32) / full-array pad copies here; the
    # kernel upcasts each streamed tile on-chip.  Callers can pass bool/uint8/
    # bf16 masks directly to shrink the shared target stream.
    t2d = _flatten_to_lanes(target)
    p2ds = [_flatten_to_lanes(pred_dict[k]) for k in keys]

    level_sums = _ds_bce_level_sums(t2d, p2ds, tile_rows=tile_rows,
                                    binary_target=binary_target)
    w0 = jnp.array([1.0 if k == "level_0" else 0.0 for k in keys], jnp.float32)
    weights = w0 + (1.0 - w0) * aux_weight
    return jnp.sum(weights * (level_sums / jnp.float32(numel)))


def _ds_bce_loss_ref(pred_dict, target, aux_weight=0.4):
    """Pure-JAX reference for correctness checks."""
    target = target.astype(jnp.float32)

    def bce(p, t):
        log_p = jnp.maximum(jnp.log(p), -100.0)
        log_1mp = jnp.maximum(jnp.log(1.0 - p), -100.0)
        return jnp.mean(-(t * log_p + (1.0 - t) * log_1mp))

    loss = 0.0
    for k in pred_dict.keys():
        w = 1.0 if k == "level_0" else aux_weight
        loss = loss + w * bce(pred_dict[k].astype(jnp.float32), target)
    return loss


if __name__ == "__main__":
    key = jax.random.PRNGKey(0)

    # Shapes consistent with a deep-supervised segmentation head.
    N, C, H, W = 2, 4, 16, 16
    k0, k1, k2, kt = jax.random.split(key, 4)
    pred = {
        "level_0": jax.nn.sigmoid(jax.random.normal(k0, (N, C, H, W), jnp.float32)),
        "level_1": jax.nn.sigmoid(jax.random.normal(k1, (N, C, H, W), jnp.float32)),
        "level_2": jax.nn.sigmoid(jax.random.normal(k2, (N, C, H, W), jnp.float32)),
    }
    target = jax.random.bernoulli(kt, 0.5, (N, C, H, W)).astype(jnp.float32)
    ref = _ds_bce_loss_ref(pred, target, aux_weight=0.4)

    # 1) Default (two-log) path, jitted so the wrapper reshape is a free bitcast.
    loss = jax.block_until_ready(jax.jit(ds_bce_loss)(pred, target))
    assert jnp.allclose(loss, ref, rtol=1e-5, atol=1e-5), (loss, ref)

    # 2) Single-log fast path (exact for 0/1 masks; halves EUP work on v7x).
    loss_bin = jax.block_until_ready(
        jax.jit(functools.partial(ds_bce_loss, binary_target=True))(pred, target))
    assert jnp.allclose(loss_bin, ref, rtol=1e-5, atol=1e-5), (loss_bin, ref)

    # 3) Multi-tile grid with a ragged (masked) last tile.
    ka, kb, kc = jax.random.split(k1, 3)
    pred3 = {
        "level_0": jax.nn.sigmoid(jax.random.normal(ka, (2, 3, 16, 32), jnp.float32)),
        "level_1": jax.nn.sigmoid(jax.random.normal(kb, (2, 3, 16, 32), jnp.float32)),
    }
    target3 = jax.random.bernoulli(kc, 0.5, (2, 3, 16, 32)).astype(jnp.float32)
    loss3 = jax.block_until_ready(
        jax.jit(functools.partial(ds_bce_loss, tile_rows=16))(pred3, target3))
    ref3 = _ds_bce_loss_ref(pred3, target3, aux_weight=0.4)
    assert jnp.allclose(loss3, ref3, rtol=1e-5, atol=1e-5), (loss3, ref3)

    # 4) Tile large enough to exercise the 256-row chunked accumulate.
    kd, ke, kf = jax.random.split(k2, 3)
    pred4 = {
        "level_0": jax.nn.sigmoid(jax.random.normal(kd, (2, 4, 64, 128), jnp.float32)),
        "level_1": jax.nn.sigmoid(jax.random.normal(ke, (2, 4, 64, 128), jnp.float32)),
    }
    target4 = jax.random.bernoulli(kf, 0.5, (2, 4, 64, 128)).astype(jnp.float32)
    loss4 = jax.block_until_ready(jax.jit(ds_bce_loss)(pred4, target4))
    ref4 = _ds_bce_loss_ref(pred4, target4, aux_weight=0.4)
    assert jnp.allclose(loss4, ref4, rtol=1e-5, atol=1e-5), (loss4, ref4)

    print("KERNEL_OK")
</pallas_src>

<mosaic_0001>
module attributes {stable_mosaic.version = 11 : i64} {
  func.func @kernel(%arg0: i32, %arg1: i32, %arg2: memref<16x128xf32, #tpu.memory_space<vmem>>, %arg3: memref<16x128xf32, #tpu.memory_space<vmem>>, %arg4: memref<16x128xf32, #tpu.memory_space<vmem>>, %arg5: memref<16x128xf32, #tpu.memory_space<vmem>>, %arg6: memref<1x3x8x128xf32, #tpu.memory_space<vmem>>, %arg7: memref<3x8x128xf32, #tpu.memory_space<vmem>>) attributes {dimension_semantics = [#tpu.dimension_semantics<arbitrary>, #tpu.dimension_semantics<arbitrary>], iteration_bounds = array<i64: 1, 1>, scalar_prefetch = 0 : i64, scratch_operands = 1 : i64, tpu.core_type = #tpu.core_type<tc>, window_params = [{transform_indices = @transform_0, window_bounds = array<i64: 16, 128>}, {transform_indices = @transform_1, window_bounds = array<i64: 16, 128>}, {transform_indices = @transform_2, window_bounds = array<i64: 16, 128>}, {transform_indices = @transform_3, window_bounds = array<i64: 16, 128>}, {transform_indices = @transform_4, window_bounds = array<i64: 1, 3, 8, 128>}]} {
    %c0_i32 = arith.constant 0 : i32
    %0 = arith.cmpi eq, %arg1, %c0_i32 : i32
    %1 = arith.extui %0 : i1 to i32
    %c0_i32_0 = arith.constant 0 : i32
    %2 = arith.cmpi ne, %1, %c0_i32_0 : i32
    scf.if %2 {
      %cst_41 = arith.constant 0.000000e+00 : f32
      %75 = vector.broadcast %cst_41 : f32 to vector<3x8x128xf32>
      %c0_42 = arith.constant 0 : index
      %c0_43 = arith.constant 0 : index
      %c0_44 = arith.constant 0 : index
      %76 = vector.load %arg7[%c0_42, %c0_43, %c0_44] : memref<3x8x128xf32, #tpu.memory_space<vmem>>, vector<3x8x128xf32>
      tpu.vector_store %arg7[%c0_42, %c0_43, %c0_44], %75 {strides = array<i32>} : memref<3x8x128xf32, #tpu.memory_space<vmem>>, vector<3x8x128xf32>,
    } else {
    }
    %c0 = arith.constant 0 : index
    %c0_1 = arith.constant 0 : index
    %3 = vector.load %arg2[%c0, %c0_1] : memref<16x128xf32, #tpu.memory_space<vmem>>, vector<16x128xf32>
    %cst = arith.constant 1.000000e+00 : f32
    %4 = vector.broadcast %cst : f32 to vector<16x128xf32>
    %5 = arith.subf %4, %3 : vector<16x128xf32>
    %c0_2 = arith.constant 0 : index
    %c0_3 = arith.constant 0 : index
    %6 = vector.load %arg3[%c0_2, %c0_3] : memref<16x128xf32, #tpu.memory_space<vmem>>, vector<16x128xf32>
    %7 = math.log %6 : vector<16x128xf32>
    %cst_4 = arith.constant -1.000000e+02 : f32
    %8 = vector.broadcast %cst_4 : f32 to vector<16x128xf32>
    %9 = arith.maximumf %7, %8 : vector<16x128xf32>
    %cst_5 = arith.constant 1.000000e+00 : f32
    %10 = vector.broadcast %cst_5 : f32 to vector<16x128xf32>
    %11 = arith.subf %10, %6 : vector<16x128xf32>
    %12 = math.log %11 : vector<16x128xf32>
    %cst_6 = arith.constant -1.000000e+02 : f32
    %13 = vector.broadcast %cst_6 : f32 to vector<16x128xf32>
    %14 = arith.maximumf %12, %13 : vector<16x128xf32>
    %15 = arith.mulf %3, %9 : vector<16x128xf32>
    %16 = arith.mulf %5, %14 : vector<16x128xf32>
    %17 = arith.addf %15, %16 : vector<16x128xf32>
    %cst_7 = arith.constant 0.000000e+00 : f32
    %18 = vector.broadcast %cst_7 : f32 to vector<16x128xf32>
    %19 = arith.subf %18, %17 : vector<16x128xf32>
    %c0_8 = arith.constant 0 : index
    %c0_9 = arith.constant 0 : index
    %c0_10 = arith.constant 0 : index
    %20 = vector.load %arg7[%c0_8, %c0_9, %c0_10] : memref<3x8x128xf32, #tpu.memory_space<vmem>>, vector<1x8x128xf32>
    %21 = vector.shape_cast %20 : vector<1x8x128xf32> to vector<8x128xf32>
    %22 = vector.shape_cast %19 : vector<16x128xf32> to vector<2x8x128xf32>
    %cst_11 = arith.constant dense<0.000000e+00> : vector<8x128xf32>
    %23 = vector.multi_reduction <add>, %22, %cst_11 [0] : vector<2x8x128xf32> to vector<8x128xf32>
    %24 = arith.addf %21, %23 : vector<8x128xf32>
    %c0_12 = arith.constant 0 : index
    %c0_13 = arith.constant 0 : index
    %c0_14 = arith.constant 0 : index
    %25 = vector.load %arg7[%c0_12, %c0_13, %c0_14] : memref<3x8x128xf32, #tpu.memory_space<vmem>>, vector<1x8x128xf32>
    %26 = vector.shape_cast %25 : vector<1x8x128xf32> to vector<8x128xf32>
    %27 = vector.shape_cast %24 : vector<8x128xf32> to vector<1x8x128xf32>
    tpu.vector_store %arg7[%c0_12, %c0_13, %c0_14], %27 {strides = array<i32>} : memref<3x8x128xf32, #tpu.memory_space<vmem>>, vector<1x8x128xf32>,
    %c0_15 = arith.constant 0 : index
    %c0_16 = arith.constant 0 : index
    %28 = vector.load %arg4[%c0_15, %c0_16] : memref<16x128xf32, #tpu.memory_space<vmem>>, vector<16x128xf32>
    %29 = math.log %28 : vector<16x128xf32>
    %cst_17 = arith.constant -1.000000e+02 : f32
    %30 = vector.broadcast %cst_17 : f32 to vector<16x128xf32>
    %31 = arith.maximumf %29, %30 : vector<16x128xf32>
    %cst_18 = arith.constant 1.000000e+00 : f32
    %32 = vector.broadcast %cst_18 : f32 to vector<16x128xf32>
    %33 = arith.subf %32, %28 : vector<16x128xf32>
    %34 = math.log %33 : vector<16x128xf32>
    %cst_19 = arith.constant -1.000000e+02 : f32
    %35 = vector.broadcast %cst_19 : f32 to vector<16x128xf32>
    %36 = arith.maximumf %34, %35 : vector<16x128xf32>
    %37 = arith.mulf %3, %31 : vector<16x128xf32>
    %38 = arith.mulf %5, %36 : vector<16x128xf32>
    %39 = arith.addf %37, %38 : vector<16x128xf32>
    %cst_20 = arith.constant 0.000000e+00 : f32
    %40 = vector.broadcast %cst_20 : f32 to vector<16x128xf32>
    %41 = arith.subf %40, %39 : vector<16x128xf32>
    %c1 = arith.constant 1 : index
    %c0_21 = arith.constant 0 : index
    %c0_22 = arith.constant 0 : index
    %42 = vector.load %arg7[%c1, %c0_21, %c0_22] : memref<3x8x128xf32, #tpu.memory_space<vmem>>, vector<1x8x128xf32>
    %43 = vector.shape_cast %42 : vector<1x8x128xf32> to vector<8x128xf32>
    %44 = vector.shape_cast %41 : vector<16x128xf32> to vector<2x8x128xf32>
    %cst_23 = arith.constant dense<0.000000e+00> : vector<8x128xf32>
    %45 = vector.multi_reduction <add>, %44, %cst_23 [0] : vector<2x8x128xf32> to vector<8x128xf32>
    %46 = arith.addf %43, %45 : vector<8x128xf32>
    %c1_24 = arith.constant 1 : index
    %c0_25 = arith.constant 0 : index
    %c0_26 = arith.constant 0 : index
    %47 = vector.load %arg7[%c1_24, %c0_25, %c0_26] : memref<3x8x128xf32, #tpu.memory_space<vmem>>, vector<1x8x128xf32>
    %48 = vector.shape_cast %47 : vector<1x8x128xf32> to vector<8x128xf32>
    %49 = vector.shape_cast %46 : vector<8x128xf32> to vector<1x8x128xf32>
    tpu.vector_store %arg7[%c1_24, %c0_25, %c0_26], %49 {strides = array<i32>} : memref<3x8x128xf32, #tpu.memory_space<vmem>>, vector<1x8x128xf32>,
    %c0_27 = arith.constant 0 : index
    %c0_28 = arith.constant 0 : index
    %50 = vector.load %arg5[%c0_27, %c0_28] : memref<16x128xf32, #tpu.memory_space<vmem>>, vector<16x128xf32>
    %51 = math.log %50 : vector<16x128xf32>
    %cst_29 = arith.constant -1.000000e+02 : f32
    %52 = vector.broadcast %cst_29 : f32 to vector<16x128xf32>
    %53 = arith.maximumf %51, %52 : vector<16x128xf32>
    %cst_30 = arith.constant 1.000000e+00 : f32
    %54 = vector.broadcast %cst_30 : f32 to vector<16x128xf32>
    %55 = arith.subf %54, %50 : vector<16x128xf32>
    %56 = math.log %55 : vector<16x128xf32>
    %cst_31 = arith.constant -1.000000e+02 : f32
    %57 = vector.broadcast %cst_31 : f32 to vector<16x128xf32>
    %58 = arith.maximumf %56, %57 : vector<16x128xf32>
    %59 = arith.mulf %3, %53 : vector<16x128xf32>
    %60 = arith.mulf %5, %58 : vector<16x128xf32>
    %61 = arith.addf %59, %60 : vector<16x128xf32>
    %cst_32 = arith.constant 0.000000e+00 : f32
    %62 = vector.broadcast %cst_32 : f32 to vector<16x128xf32>
    %63 = arith.subf %62, %61 : vector<16x128xf32>
    %c2 = arith.constant 2 : index
    %c0_33 = arith.constant 0 : index
    %c0_34 = arith.constant 0 : index
    %64 = vector.load %arg7[%c2, %c0_33, %c0_34] : memref<3x8x128xf32, #tpu.memory_space<vmem>>, vector<1x8x128xf32>
    %65 = vector.shape_cast %64 : vector<1x8x128xf32> to vector<8x128xf32>
    %66 = vector.shape_cast %63 : vector<16x128xf32> to vector<2x8x128xf32>
    %cst_35 = arith.constant dense<0.000000e+00> : vector<8x128xf32>
    %67 = vector.multi_reduction <add>, %66, %cst_35 [0] : vector<2x8x128xf32> to vector<8x128xf32>
    %68 = arith.addf %65, %67 : vector<8x128xf32>
    %c2_36 = arith.constant 2 : index
    %c0_37 = arith.constant 0 : index
    %c0_38 = arith.constant 0 : index
    %69 = vector.load %arg7[%c2_36, %c0_37, %c0_38] : memref<3x8x128xf32, #tpu.memory_space<vmem>>, vector<1x8x128xf32>
    %70 = vector.shape_cast %69 : vector<1x8x128xf32> to vector<8x128xf32>
    %71 = vector.shape_cast %68 : vector<8x128xf32> to vector<1x8x128xf32>
    tpu.vector_store %arg7[%c2_36, %c0_37, %c0_38], %71 {strides = array<i32>} : memref<3x8x128xf32, #tpu.memory_space<vmem>>, vector<1x8x128xf32>,
    %c0_i32_39 = arith.constant 0 : i32
    %72 = arith.cmpi eq, %arg1, %c0_i32_39 : i32
    %73 = arith.extui %72 : i1 to i32
    %c0_i32_40 = arith.constant 0 : i32
    %74 = arith.cmpi ne, %73, %c0_i32_40 : i32
    scf.if %74 {
      %c0_41 = arith.constant 0 : index
      %c0_42 = arith.constant 0 : index
      %c0_43 = arith.constant 0 : index
      %75 = vector.load %arg7[%c0_41, %c0_42, %c0_43] : memref<3x8x128xf32, #tpu.memory_space<vmem>>, vector<3x8x128xf32>
      %76 = vector.shape_cast %75 : vector<3x8x128xf32> to vector<1x3x8x128xf32>
      %c0_44 = arith.constant 0 : index
      %c0_45 = arith.constant 0 : index
      %c0_46 = arith.constant 0 : index
      %c0_47 = arith.constant 0 : index
      %77 = vector.load %arg6[%c0_44, %c0_45, %c0_46, %c0_47] : memref<1x3x8x128xf32, #tpu.memory_space<vmem>>, vector<1x3x8x128xf32>
      tpu.vector_store %arg6[%c0_44, %c0_45, %c0_46, %c0_47], %76 {strides = array<i32>} : memref<1x3x8x128xf32, #tpu.memory_space<vmem>>, vector<1x3x8x128xf32>,
    } else {
    }
    return
  }
  func.func @transform_0(%arg0: i32, %arg1: i32) -> (i32, i32) {
    %c1_i32 = arith.constant 1 : i32
    %0 = arith.muli %arg0, %c1_i32 : i32
    %1 = arith.addi %0, %arg1 : i32
    %c0_i32 = arith.constant 0 : i32
    %c0_i32_0 = arith.constant 0 : i32
    return %1, %c0_i32 : i32, i32
  }
  func.func @transform_1(%arg0: i32, %arg1: i32) -> (i32, i32) {
    %c1_i32 = arith.constant 1 : i32
    %0 = arith.muli %arg0, %c1_i32 : i32
    %1 = arith.addi %0, %arg1 : i32
    %c0_i32 = arith.constant 0 : i32
    %c0_i32_0 = arith.constant 0 : i32
    return %1, %c0_i32 : i32, i32
  }
  func.func @transform_2(%arg0: i32, %arg1: i32) -> (i32, i32) {
    %c1_i32 = arith.constant 1 : i32
    %0 = arith.muli %arg0, %c1_i32 : i32
    %1 = arith.addi %0, %arg1 : i32
    %c0_i32 = arith.constant 0 : i32
    %c0_i32_0 = arith.constant 0 : i32
    return %1, %c0_i32 : i32, i32
  }
  func.func @transform_3(%arg0: i32, %arg1: i32) -> (i32, i32) {
    %c1_i32 = arith.constant 1 : i32
    %0 = arith.muli %arg0, %c1_i32 : i32
    %1 = arith.addi %0, %arg1 : i32
    %c0_i32 = arith.constant 0 : i32
    %c0_i32_0 = arith.constant 0 : i32
    return %1, %c0_i32 : i32, i32
  }
  func.func @transform_4(%arg0: i32, %arg1: i32) -> (i32, i32, i32, i32) {
    %c0_i32 = arith.constant 0 : i32
    %c0_i32_0 = arith.constant 0 : i32
    %c0_i32_1 = arith.constant 0 : i32
    %c0_i32_2 = arith.constant 0 : i32
    return %arg0, %c0_i32, %c0_i32_0, %c0_i32_1 : i32, i32, i32, i32
  }
}

</mosaic_0001>

<bundles_post_ra>
// kernel: ds_bce_loss.1
= control target key start
LH: loop header
LB: loop body
LE: loop exit
PB: predicated region body
PF: predicated region fallthrough
CT: control target
= control target key end

     0   :  { %s321_s1 = inlined_call_operand.vmem [shape: f32[16,128], index: 1, kind: input, shape index: {}]   ;;  %s322_s2 = inlined_call_operand.vmem [shape: f32[16,128], index: 2, kind: input, shape index: {}]   ;;  %s323_s3 = inlined_call_operand.vmem [shape: f32[16,128], index: 3, kind: input, shape index: {}]   ;;  %s324_s0 = inlined_call_operand.vmem [shape: f32[16,128], index: 0, kind: input, shape index: {}]   ;;  %s325_s4 = inlined_call_operand.vmem [shape: f32[1,3,8,128], index: 4, kind: output, shape index: {}]  }
   0x1   :  { %v116_v0 = vld [vmem:[%s321_s1] sm:$0xff]  ;;  %v117_v1 = vld [vmem:[%s321_s1 + $0x8] sm:$0xff] }
   0x2   :  { %239 = vlog2.f32 %v116_v0  ;;  %v124_v2 = vsub.f32 1.0, %v116_v0  ;;  %v144_v3 = vld [vmem:[%s322_s2] sm:$0xff]  ;;  %v145_v4 = vld [vmem:[%s322_s2 + $0x8] sm:$0xff]  ;;  %v125_v5 = vsub.f32 1.0, %v117_v1 }
   0x3   :  { %241 = vlog2.f32 %v117_v1  ;;  %v152_v6 = vsub.f32 1.0, %v144_v3  ;;  %v153_v7 = vsub.f32 1.0, %v145_v4  ;;  %v173_v8 = vld [vmem:[%s323_s3] sm:$0xff]  ;;  %v174_v9 = vld [vmem:[%s323_s3 + $0x8] sm:$0xff] }
   0x4   :  { %243 = vlog2.f32 %v124_v2  ;;  %v181_v10 = vsub.f32 1.0, %v173_v8  ;;  %v182_v11 = vsub.f32 1.0, %v174_v9  ;;  %v112_v13 = vld [vmem:[%s324_s0] sm:$0xff]  ;;  %v113_v15 = vld [vmem:[%s324_s0 + $0x8] sm:$0xff] }
   0x5   :  { %245 = vlog2.f32 %v125_v5  ;;  %v114_v20 = vsub.f32 1.0, %v112_v13  ;;  %v115_v24 = vsub.f32 1.0, %v113_v15 }
   0x6   :  { %247 = vlog2.f32 %v144_v3 }
   0x7   :  { %249 = vlog2.f32 %v145_v4 }
   0x8   :  { %251 = vlog2.f32 %v152_v6 }
   0x9   :  { %253 = vlog2.f32 %v153_v7 }
   0xa   :  { %255 = vlog2.f32 %v173_v8 }
   0xb   :  { %257 = vlog2.f32 %v174_v9 }
   0xc   :  { %v240_v12 = vpop.eup %239  ;;  %259 = vlog2.f32 %v181_v10 }
   0xd   :  { %v242_v14 = vpop.eup %241  ;;  %v119_v16 = vmul.f32 0.6931472, %v240_v12  ;;  %261 = vlog2.f32 %v182_v11 }
   0xe   :  { %v244_v17 = vpop.eup %243  ;;  %v121_v18 = vmul.f32 0.6931472, %v242_v14 }
   0xf   :  { %v246_v19 = vpop.eup %245  ;;  %v122_v21 = vmax.f32 %v119_v16, -100.0  ;;  %v127_v22 = vmul.f32 0.6931472, %v244_v17 }
  0x10   :  { %v248_v23 = vpop.eup %247  ;;  %v123_v25 = vmax.f32 %v121_v18, -100.0  ;;  %v129_v26 = vmul.f32 0.6931472, %v246_v19 }
  0x11   :  { %v250_v27 = vpop.eup %249  ;;  %v130_v28 = vmax.f32 %v127_v22, -100.0  ;;  %v132_v29 = vmul.f32 %v122_v21, %v112_v13  ;;  %v147_v30 = vmul.f32 0.6931472, %v248_v23 }
  0x12   :  { %v252_v31 = vpop.eup %251  ;;  %v131_v32 = vmax.f32 %v129_v26, -100.0  ;;  %v133_v33 = vmul.f32 %v123_v25, %v113_v15  ;;  %v149_v34 = vmul.f32 0.6931472, %v250_v27 }
  0x13   :  { %v254_v35 = vpop.eup %253  ;;  %v134_v36 = vmul.f32 %v130_v28, %v114_v20  ;;  %v150_v37 = vmax.f32 %v147_v30, -100.0  ;;  %v155_v38 = vmul.f32 0.6931472, %v252_v31 }
  0x14   :  { %v256_v39 = vpop.eup %255  ;;  %v135_v40 = vmul.f32 %v131_v32, %v115_v24  ;;  %v151_v41 = vmax.f32 %v149_v34, -100.0  ;;  %v157_v42 = vmul.f32 0.6931472, %v254_v35 }
  0x15   :  { %v258_v43 = vpop.eup %257  ;;  %v136_v44 = vadd.f32 %v134_v36, %v132_v29  ;;  %v158_v45 = vmax.f32 %v155_v38, -100.0  ;;  %v160_v46 = vmul.f32 %v150_v37, %v112_v13  ;;  %v176_v47 = vmul.f32 0.6931472, %v256_v39 }
  0x16   :  { %v260_v48 = vpop.eup %259  ;;  %v137_v49 = vadd.f32 %v135_v40, %v133_v33  ;;  %v159_v50 = vmax.f32 %v157_v42, -100.0  ;;  %v161_v51 = vmul.f32 %v151_v41, %v113_v15  ;;  %v178_v52 = vmul.f32 0.6931472, %v258_v43 }
  0x17   :  { %v262_v53 = vpop.eup %261  ;;  %v138_v54 = vsub.f32 0.0, %v136_v44  ;;  %v162_v55 = vmul.f32 %v158_v45, %v114_v20  ;;  %v179_v56 = vmax.f32 %v176_v47, -100.0  ;;  %v184_v57 = vmul.f32 0.6931472, %v260_v48 }
  0x18   :  { %v139_v58 = vsub.f32 0.0, %v137_v49  ;;  %v163_v59 = vmul.f32 %v159_v50, %v115_v24  ;;  %v180_v60 = vmax.f32 %v178_v52, -100.0  ;;  %v186_v61 = vmul.f32 0.6931472, %v262_v53 }
  0x19   :  { %v164_v62 = vadd.f32 %v162_v55, %v160_v46  ;;  %v187_v63 = vmax.f32 %v184_v57, -100.0  ;;  %v189_v0 = vmul.f32 %v179_v56, %v112_v13 }
  0x1a   :  { %v141_v1 = vadd.f32 %v139_v58, %v138_v54  ;;  %v165_v2 = vadd.f32 %v163_v59, %v161_v51  ;;  %v188_v3 = vmax.f32 %v186_v61, -100.0  ;;  %v190_v4 = vmul.f32 %v180_v60, %v113_v15 }
  0x1b   :  { %v166_v5 = vsub.f32 0.0, %v164_v62  ;;  %v191_v6 = vmul.f32 %v187_v63, %v114_v20 }
  0x1c   :  { %208 = vst [vmem:[%s325_s4] sm:$0xff] %v141_v1  ;;  %v167_v7 = vsub.f32 0.0, %v165_v2  ;;  %v192_v8 = vmul.f32 %v188_v3, %v115_v24 }
  0x1d   :  { %v193_v9 = vadd.f32 %v191_v6, %v189_v0 }
  0x1e   :  { %v170_v10 = vadd.f32 %v167_v7, %v166_v5  ;;  %v194_v11 = vadd.f32 %v192_v8, %v190_v4 }
  0x1f   :  { %v195_v12 = vsub.f32 0.0, %v193_v9 }
  0x20   :  { %209 = vst [vmem:[%s325_s4 + $0x8] sm:$0xff] %v170_v10  ;;  %v196_v13 = vsub.f32 0.0, %v194_v11 }
  0x22   :  { %v199_v14 = vadd.f32 %v196_v13, %v195_v12 }
  0x24   :  { %210 = vst [vmem:[%s325_s4 + $0x10] sm:$0xff] %v199_v14 }

</bundles_post_ra>
